<compile_context>
chip_gen: v6e
topology: v6e:2x2x1
jax: 0.10.0
libtpu: 0.0.40
codegen_flags: <defaults>
</compile_context>

<pallas_src>
import functools

import jax
import jax.numpy as jnp
from jax.experimental import pallas as pl
from jax.experimental.pallas import tpu as pltpu


def att_batched_kernel(x_ref, wt_ref, b_ref, v_ref, out_ref):
    # x_ref : [G, N, D]   (G bags of N rows each, this grid step)
    # wt_ref: [D, R]      (Linear weight, pre-transposed once in the wrapper)
    # b_ref : [1, R]      (Linear bias)
    # v_ref : [1, R]      (precomputed  W_bil @ query_r)
    # out_ref: [G, R]
    G, N, D = x_ref.shape
    R = wt_ref.shape[1]

    # Linear layer: one MXU matmul over all G*N rows of this block.
    # (G,N,D) -> (G*N,D) is layout-preserving (N == sublane tile), so cheap.
    x2 = x_ref[...].reshape(G * N, D)
    h2 = jnp.dot(x2, wt_ref[...], preferred_element_type=jnp.float32) + b_ref[...]
    h = h2.reshape(G, N, R)                                    # [G, N, R]

    # Bilinear score against the fixed query: s = h . v   (b_bil omitted:
    # softmax(s + c) == softmax(s), so it cannot change the result).
    v = v_ref[...].reshape(1, 1, R)
    scores = jnp.sum(h * v, axis=-1, keepdims=True)            # [G, N, 1]  VPU + lane reduce

    # Per-bag softmax over the N rows (sublane reductions, XLU).
    m = jnp.max(scores, axis=1, keepdims=True)                 # [G, 1, 1]
    e = jnp.exp(scores - m)                                    # EUP
    denom = jnp.sum(e, axis=1, keepdims=True)                  # [G, 1, 1]
    inv = pl.reciprocal(denom, approx=True)                    # EUP vrcp (free slot)
    inv = inv * (2.0 - denom * inv)                            # one Newton step -> ~f32 exact
    alpha = e * inv                                            # [G, N, 1]

    # Weighted bag representation: sum_n alpha_n * h_n  (VPU mul + sublane reduce,
    # no tiny 1xN MXU matmul, no transpose).
    out_ref[...] = jnp.sum(alpha * h, axis=1)                  # [G, R]


def prepare_params(w_lin, b_lin, w_bil, b_bil, query_r):
    """One-time parameter preparation (transpose / cast / fold) outside the hot path."""
    R, D = w_lin.shape
    del b_bil  # softmax-shift-invariant -> has no effect on the forward output
    w_t = jnp.asarray(w_lin, jnp.float32).T                        # [D, R]
    b = jnp.asarray(b_lin, jnp.float32).reshape(1, R)              # [1, R]
    v = (jnp.asarray(w_bil, jnp.float32)
         @ jnp.asarray(query_r, jnp.float32)).reshape(1, R)        # [1, R]
    return {"w_t": w_t, "b": b, "v": v}


@functools.partial(jax.jit, static_argnames=("bags_per_step",))
def att_forward_batched(x_bags, params, *, bags_per_step=8):
    """x_bags: [B, N, D] float32 -> [B, R].

    Each bag b gets the exact PyTorch ATT forward applied to x_bags[b].
    For bag size N == 1 the PyTorch module skips attention, so we do too.
    """
    B, N, D = x_bags.shape
    R = params["w_t"].shape[1]
    x_bags = x_bags.astype(jnp.float32)

    if N <= 1:
        # PyTorch path for bag size 1: plain linear, no attention (glue path).
        return x_bags.reshape(B, D) @ params["w_t"] + params["b"]

    G = bags_per_step
    pad = (-B) % G
    if pad:
        x_bags = jnp.concatenate(
            [x_bags, jnp.zeros((pad, N, D), jnp.float32)], axis=0)
    Bp = B + pad

    out = pl.pallas_call(
        att_batched_kernel,
        out_shape=jax.ShapeDtypeStruct((Bp, R), jnp.float32),
        grid_spec=pltpu.PrefetchScalarGridSpec(
            num_scalar_prefetch=0,
            grid=(Bp // G,),
            in_specs=[
                pl.BlockSpec((G, N, D), lambda i: (i, 0, 0)),   # x (per bag-group)
                pl.BlockSpec((D, R), lambda i: (0, 0)),         # W_lin^T (resident)
                pl.BlockSpec((1, R), lambda i: (0, 0)),         # b_lin
                pl.BlockSpec((1, R), lambda i: (0, 0)),         # v = W_bil @ q
            ],
            out_specs=pl.BlockSpec((G, R), lambda i: (i, 0)),
        ),
        compiler_params=pltpu.CompilerParams(
            dimension_semantics=("parallel",),   # bag-group axis: shard across TCs
        ),
    )(x_bags, params["w_t"], params["b"], params["v"])

    return out[:B]


def att_reference_bag(x, w_lin, b_lin, w_bil, b_bil, query_r):
    """Pure-JAX reference mirroring the PyTorch forward for a single bag [N, D]."""
    h = x @ w_lin.T + b_lin                              # [N, R]
    if x.shape[0] > 1:
        scores = h @ (w_bil @ query_r) + b_bil[0]        # [N]
        alpha = jax.nn.softmax(scores[None, :], axis=1)  # [1, N]
        return alpha @ h                                 # [1, R]
    return h


if __name__ == "__main__":
    # Small shapes consistent with the module: bags of N sentence embeddings of
    # dim D (encoder_out_dimension), projected to R relation logits (rel_num),
    # batched over B bags so the kernel has a real grid to pipeline.
    B = 32    # number of bags batched into one kernel launch
    N = 8     # bag size (> 1, so the attention path runs)
    D = 32    # opt.encoder_out_dimension
    R = 16    # opt.rel_num

    key = jax.random.PRNGKey(0)
    k_x, k_wl, k_bl, k_wb, k_bb, k_q = jax.random.split(key, 6)

    x_bags = jax.random.normal(k_x, (B, N, D), dtype=jnp.float32)

    # Parameter shapes match nn.Linear / nn.Bilinear / query_r.
    w_lin = jax.random.normal(k_wl, (R, D), dtype=jnp.float32) * 0.1   # Linear.weight [R, D]
    b_lin = jax.random.normal(k_bl, (R,), dtype=jnp.float32) * 0.1     # Linear.bias   [R]
    w_bil = jax.random.normal(k_wb, (R, R), dtype=jnp.float32) * 0.1   # Bilinear.weight[0] [R, R]
    b_bil = jax.random.normal(k_bb, (1,), dtype=jnp.float32) * 0.1     # Bilinear.bias [1]
    query_r = jax.random.normal(k_q, (R,), dtype=jnp.float32)          # query_r [R]

    params = prepare_params(w_lin, b_lin, w_bil, b_bil, query_r)       # one-time prep

    # Attention path (N > 1), all bags in one pallas_call.
    out = att_forward_batched(x_bags, params, bags_per_step=8)
    out = jax.block_until_ready(out)
    assert out.shape == (B, R), out.shape

    ref = jnp.stack(
        [att_reference_bag(x_bags[i], w_lin, b_lin, w_bil, b_bil, query_r)[0]
         for i in range(B)],
        axis=0)
    assert jnp.allclose(out, ref, atol=2e-5, rtol=2e-5), (
        float(jnp.max(jnp.abs(out - ref))))

    # Bag-size-1 path (PyTorch skips attention -> plain linear).
    x1 = x_bags[:, :1, :]
    out1 = jax.block_until_ready(att_forward_batched(x1, params))
    ref1 = x1.reshape(B, D) @ w_lin.T + b_lin
    assert jnp.allclose(out1, ref1, atol=2e-5, rtol=2e-5)

    print("KERNEL_OK")
</pallas_src>

<mosaic_0001>
module attributes {stable_mosaic.version = 11 : i64} {
  func.func @att_batched_kernel(%arg0: i32, %arg1: memref<8x8x32xf32, #tpu.memory_space<vmem>>, %arg2: memref<32x16xf32, #tpu.memory_space<vmem>>, %arg3: memref<1x16xf32, #tpu.memory_space<vmem>>, %arg4: memref<1x16xf32, #tpu.memory_space<vmem>>, %arg5: memref<8x16xf32, #tpu.memory_space<vmem>>) attributes {dimension_semantics = [#tpu.dimension_semantics<parallel>], iteration_bounds = array<i64: 4>, scalar_prefetch = 0 : i64, scratch_operands = 0 : i64, tpu.core_type = #tpu.core_type<tc>, window_params = [{transform_indices = @transform_0, window_bounds = array<i64: 8, 8, 32>}, {pipeline_mode = #tpu.pipeline_mode<synchronous>, transform_indices = @transform_1, window_bounds = array<i64: 32, 16>}, {pipeline_mode = #tpu.pipeline_mode<synchronous>, transform_indices = @transform_2, window_bounds = array<i64: 1, 16>}, {pipeline_mode = #tpu.pipeline_mode<synchronous>, transform_indices = @transform_3, window_bounds = array<i64: 1, 16>}, {transform_indices = @transform_4, window_bounds = array<i64: 8, 16>}]} {
    %c0 = arith.constant 0 : index
    %c0_0 = arith.constant 0 : index
    %c0_1 = arith.constant 0 : index
    %0 = vector.load %arg1[%c0, %c0_0, %c0_1] : memref<8x8x32xf32, #tpu.memory_space<vmem>>, vector<8x8x32xf32>
    %1 = vector.shape_cast %0 : vector<8x8x32xf32> to vector<64x32xf32>
    %c0_2 = arith.constant 0 : index
    %c0_3 = arith.constant 0 : index
    %2 = vector.load %arg2[%c0_2, %c0_3] : memref<32x16xf32, #tpu.memory_space<vmem>>, vector<32x16xf32>
    %cst = arith.constant dense<0.000000e+00> : vector<64x16xf32>
    %3 = tpu.matmul %1, %2, %cst {dimension_numbers = #tpu.dot_dimension_numbers<[1], [0], [0], [1], [0, 0, 1, 1], [], []>} : vector<64x32xf32>, vector<32x16xf32>, vector<64x16xf32> -> vector<64x16xf32>
    %c0_4 = arith.constant 0 : index
    %c0_5 = arith.constant 0 : index
    %4 = vector.load %arg3[%c0_4, %c0_5] : memref<1x16xf32, #tpu.memory_space<vmem>>, vector<1x16xf32>
    %5 = vector.broadcast %4 : vector<1x16xf32> to vector<64x16xf32>
    %6 = arith.addf %3, %5 : vector<64x16xf32>
    %7 = vector.shape_cast %6 : vector<64x16xf32> to vector<8x8x16xf32>
    %c0_6 = arith.constant 0 : index
    %c0_7 = arith.constant 0 : index
    %8 = vector.load %arg4[%c0_6, %c0_7] : memref<1x16xf32, #tpu.memory_space<vmem>>, vector<1x16xf32>
    %9 = vector.shape_cast %8 : vector<1x16xf32> to vector<1x1x16xf32>
    %10 = vector.broadcast %9 : vector<1x1x16xf32> to vector<8x8x16xf32>
    %11 = arith.mulf %7, %10 : vector<8x8x16xf32>
    %cst_8 = arith.constant dense<0.000000e+00> : vector<8x8xf32>
    %12 = vector.multi_reduction <add>, %11, %cst_8 [2] : vector<8x8x16xf32> to vector<8x8xf32>
    %13 = vector.shape_cast %12 : vector<8x8xf32> to vector<8x8x1xf32>
    %cst_9 = arith.constant dense<0xFF800000> : vector<8x1xf32>
    %14 = vector.multi_reduction <maximumf>, %13, %cst_9 [1] : vector<8x8x1xf32> to vector<8x1xf32>
    %15 = vector.shape_cast %14 : vector<8x1xf32> to vector<8x1x1xf32>
    %16 = vector.broadcast %15 : vector<8x1x1xf32> to vector<8x8x1xf32>
    %17 = arith.subf %13, %16 : vector<8x8x1xf32>
    %18 = math.exp %17 : vector<8x8x1xf32>
    %cst_10 = arith.constant dense<0.000000e+00> : vector<8x1xf32>
    %19 = vector.multi_reduction <add>, %18, %cst_10 [1] : vector<8x8x1xf32> to vector<8x1xf32>
    %20 = vector.shape_cast %19 : vector<8x1xf32> to vector<8x1x1xf32>
    %21 = tpu.reciprocal %20 {approx = true} : vector<8x1x1xf32> -> vector<8x1x1xf32>
    %22 = arith.mulf %20, %21 : vector<8x1x1xf32>
    %cst_11 = arith.constant 2.000000e+00 : f32
    %23 = vector.broadcast %cst_11 : f32 to vector<8x1x1xf32>
    %24 = arith.subf %23, %22 : vector<8x1x1xf32>
    %25 = arith.mulf %21, %24 : vector<8x1x1xf32>
    %26 = vector.broadcast %25 : vector<8x1x1xf32> to vector<8x8x1xf32>
    %27 = arith.mulf %18, %26 : vector<8x8x1xf32>
    %28 = vector.broadcast %27 : vector<8x8x1xf32> to vector<8x8x16xf32>
    %29 = arith.mulf %28, %7 : vector<8x8x16xf32>
    %cst_12 = arith.constant dense<0.000000e+00> : vector<8x16xf32>
    %30 = vector.multi_reduction <add>, %29, %cst_12 [1] : vector<8x8x16xf32> to vector<8x16xf32>
    %c0_13 = arith.constant 0 : index
    %c0_14 = arith.constant 0 : index
    %31 = vector.load %arg5[%c0_13, %c0_14] : memref<8x16xf32, #tpu.memory_space<vmem>>, vector<8x16xf32>
    tpu.vector_store %arg5[%c0_13, %c0_14], %30 {strides = array<i32>} : memref<8x16xf32, #tpu.memory_space<vmem>>, vector<8x16xf32>,
    return
  }
  func.func @transform_0(%arg0: i32) -> (i32, i32, i32) {
    %c0_i32 = arith.constant 0 : i32
    %c0_i32_0 = arith.constant 0 : i32
    %c0_i32_1 = arith.constant 0 : i32
    return %arg0, %c0_i32, %c0_i32_0 : i32, i32, i32
  }
  func.func @transform_1(%arg0: i32) -> (i32, i32) {
    %c0_i32 = arith.constant 0 : i32
    %c0_i32_0 = arith.constant 0 : i32
    %c0_i32_1 = arith.constant 0 : i32
    return %c0_i32, %c0_i32_0 : i32, i32
  }
  func.func @transform_2(%arg0: i32) -> (i32, i32) {
    %c0_i32 = arith.constant 0 : i32
    %c0_i32_0 = arith.constant 0 : i32
    %c0_i32_1 = arith.constant 0 : i32
    return %c0_i32, %c0_i32_0 : i32, i32
  }
  func.func @transform_3(%arg0: i32) -> (i32, i32) {
    %c0_i32 = arith.constant 0 : i32
    %c0_i32_0 = arith.constant 0 : i32
    %c0_i32_1 = arith.constant 0 : i32
    return %c0_i32, %c0_i32_0 : i32, i32
  }
  func.func @transform_4(%arg0: i32) -> (i32, i32) {
    %c0_i32 = arith.constant 0 : i32
    %c0_i32_0 = arith.constant 0 : i32
    return %arg0, %c0_i32 : i32, i32
  }
}

</mosaic_0001>

<bundles_post_ra>
// kernel: att_forward_batched.1
= control target key start
LH: loop header
LB: loop body
LE: loop exit
PB: predicated region body
PF: predicated region fallthrough
CT: control target
= control target key end

     0   :  { %9 = vsyncpa [#allocation3], 0  ;;  %s1172_s0 = inlined_call_operand.hbm [shape: f32[32,8,32], index: 0, kind: input, shape index: {}]   ;;  %s1173_s1 = inlined_call_operand.vmem [shape: f32[32,16], index: 1, kind: input, shape index: {}]   ;;  %s1174_s2 = inlined_call_operand.vmem [shape: f32[1,16], index: 2, kind: input, shape index: {}]   ;;  %s1175_s3 = inlined_call_operand.vmem [shape: f32[1,16], index: 3, kind: input, shape index: {}]   ;;  %s1176_s4 = inlined_call_operand.vmem [shape: f32[32,16], index: 4, kind: output, shape index: {}]  }
   0x1   :  { %11 = vsyncpa [#allocation3 + $0x1], 0  ;;  %s946_s15 = smov 0   ;;  %s948_s16 = smov 0  }
   0x2   :  { %s950_s17 = smov 0   ;;  %s952_s18 = smov 0  }
   0x3 LB: > { %s965_s19 = sadd.s32 4294967295, %s916_s18   ;;  %s968_s20 = sadd.s32 1, %s916_s18   ;;  %s916_s18 = sphi %s952_s18, %s1185_s18   ;;  %s912_s17 = sphi %s950_s17, %s1184_s17   ;;  %s908_s16 = sphi %s948_s16, %s1183_s16   ;;  %s904_s15 = sphi %s946_s15, %s1182_s15  }
   0x4   : > { %s21_s21 = ssub.s32 %s916_s18, %s968_s20  ;;  %s24_s22 = sadd.s32 1, %s912_s17 }
   0x5   : > { %p22_p0 = scmp.eq.s32.totalorder %s21_s21, 0  ;;  %p31_p1 = scmp.ne.s32.totalorder %s912_s17, %s908_s16 }
   0x6   : > { %p32_p2 = scmp.eq.s32.totalorder %s916_s18, 0  ;;  %p37_p3 = scmp.ne.s32.totalorder %s908_s16, %s904_s15 }
   0x7   : > { %s978_s23 = scalar_select %p22_p0, %s912_s17, %s24_s22  }
   0x8   : > { %p33_p4 = por %p32_p2, %p31_p1  ;;  %p38_p5 = scmp.eq.s32.totalorder %s965_s19, 0 }
   0x9   : > { %p787_p6 = scmp.lt.s32.totalorder %s916_s18, 4  ;;  %s159_s25 = sand.u32 1, %s912_s17  }
   0xa   : > { %p982_p7 = por %p38_p5, %p37_p3  ;;  %s722_s26 = sshll.u32 %s159_s25, 6 }
   0xb   : > { %s740_s27 = sshll.u32 %s916_s18, 10  ;;  %s163_s5 = scalar_lea.vmem [#allocation2], %s722_s26 }
   0xc   : > { %s1178_s24 = scalar_select %p982_p7, 1, 0 }
   0xd   : > { %s991_s30 = scalar_lea.hbm %s1172_s0, %s740_s27  ;;  %s170_s6 = sshll.u32 %s163_s5, 4  ;;  %s993_s6 = int_to_ptr.vmem [resolvable:$true] %s170_s6 }
   0xe   : > { %p995_p8 = pnand %p787_p6, %p33_p4  ;;  %s1000_s8 = scalar_lea.sflag [#allocation3], %s159_s25 }
   0xf   : > { %s854_s9 = scalar_lea.hbm %s991_s30, 1024  ;;  %s859_s12 = scalar_lea.hbm %s1172_s0, 4096 }
  0x10   : > { %p855_p10 = scmp.ne.s32.totalorder %s991_s30, %s854_s9  ;;  %p856_p11 = pneg %p995_p8 }
  0x11   : > { %p860_p0 = scmp.lt.s32.totalorder %s991_s30, %s1172_s0  ;;  %p861_p1 = scmp.lt.s32.totalorder %s859_s12, %s854_s9 }
  0x12   : > { %p857_p12 = pnand %p856_p11, %p855_p10 }
  0x13   : > { %p862_p2 = por %p861_p1, %p860_p0 }
  0x14   : > { %p858_p13 = pneg %p857_p12 }
  0x16   : > { %p863_p3 = pnand %p862_p2, %p858_p13 }
  0x18   : > { %866 = shalt.err (!%p863_p3)
}
  0x19   : > { %s867_s15 = scalar_lea.vmem %s993_s6, 1024  ;;  %s918_s21 = smov [#allocation2]  }
  0x1a   : > { %p868_p4 = scmp.ne.s32.totalorder %s993_s6, %s867_s15  ;;  %s872_s22 = sshll.u32 %s918_s21, 4  ;;  %s873_s22 = int_to_ptr.vmem [resolvable:$false] %s872_s22 }
  0x1b   : > { %s874_s25 = scalar_lea.vmem %s873_s22, 2048  ;;  %p875_p10 = scmp.lt.s32.totalorder %s993_s6, %s873_s22 }
  0x1c   : > { %p870_p5 = pnand %p868_p4, %p856_p11  ;;  %p876_p12 = scmp.lt.s32.totalorder %s874_s25, %s867_s15 }
  0x1e   : > { %p871_p6 = pneg %p870_p5  ;;  %p877_p9 = por %p876_p12, %p875_p10 }
  0x20   : > { %p878_p7 = pnand %p877_p9, %p871_p6 }
  0x22   : > { %881 = shalt.err (!%p878_p7)
}
  0x23   : > { %s919_s26 = smov 128   ;;  %s920_s27 = smov 8  }
  0x24   : > { %786 = dma.hbm_to_vmem [thread:$0]  (!%p995_p8), %s991_s30, 1024, %s993_s6, %s1000_s8, %s919_s26, %s919_s26, %s920_s27  }
  0x25   : > { %p178_p11 = scmp.lt.s32.totalorder %s916_s18, 5  ;;  %p1180_p13 = scmp.ge.s32.totalorder %s916_s18, 1 }
  0x27   : > { %p179_p0 = pnand %p1180_p13, %p178_p11 }
  0x28   : > { %s184_s28 = sand.u32 (!%p179_p0), 1, %s908_s16   ;;  %p1181_p7 = scmp.ne.s32.totalorder (!%p179_p0), %s1178_s24, 0 }
  0x29   : > { %182 = sbr.rel (%p179_p0) target bundleno = 492 (0x1ec), region = 36  ;;  %s726_s29 = sshll.u32 (!%p179_p0), %s184_s28, 6 }
  0x2a   : > { %s185_s5 = scalar_lea.sflag (!%p179_p0), [#allocation3], %s184_s28  ;;  %s1025_s9 = scalar_lea.vmem (!%p179_p0), [#allocation2], %s726_s29 }
  0x2e   : > { %899 = dma.done.wait (%p1181_p7), %s185_s5, 1024  }
  0x2f   : > { %901 = vsyncadd (%p1181_p7), %s185_s5, 4294966272  ;;  %v228_v0 = vld [vmem:[%s1173_s1 + $0x18] sm:$0xff]  ;;  %v227_v1 = vld [vmem:[%s1173_s1 + $0x10] sm:$0xff]  ;;  %vm236_vm0 = vcmask 261120   ;;  %vm381_vm1 = vcmask 130048   ;;  %vm638_vm2 = vcmask 1041409  }
  0x30   : > { %753 = vmatprep.subr.mxu0 %v228_v0  ;;  %773 = vmatprep.subr.mxu1 %v228_v0  ;;  %v217_v2 = vld [vmem:[%s1025_s9] sm:$0xff]  ;;  %v226_v3 = vld [vmem:[%s1173_s1 + $0x8] sm:$0xff]  ;;  %v219_v6 = vld [vmem:[%s1025_s9 + $0x10] sm:$0xff]  ;;  %vm640_vm3 = vcmask 1042434   ;;  %vm642_vm4 = vcmask 1043459   ;;  %p213_p8 = scmp.lt.s32.totalorder %s965_s19, 3 }
  0x31   : > { %754 = vmatpush3.msra.mxu0 %v228_v0  ;;  %777 = vmatpush3.msra.mxu1 %v228_v0  ;;  %v225_v4 = vld [vmem:[%s1173_s1] sm:$0xff]  ;;  %v218_v5 = vld [vmem:[%s1025_s9 + $0x8] sm:$0xff]  ;;  %v223_v9 = vld [vmem:[%s1025_s9 + $0x30] sm:$0xff]  ;;  %vm644_vm5 = vcmask 1044484   ;;  %vm646_vm6 = vcmask 1045509   ;;  %vm648_vm7 = vcmask 1046534  }
  0x32   : > { %755 = vmatprep.subr.mxu0 %v227_v1  ;;  %761 = vmatprep.mubr.msk.f32.mxu0 %vm236_vm0, %v217_v2  ;;  %v221_v7 = vld [vmem:[%s1025_s9 + $0x20] sm:$0xff]  ;;  %v222_v8 = vld [vmem:[%s1025_s9 + $0x28] sm:$0xff]  ;;  %v220_v10 = vld [vmem:[%s1025_s9 + $0x18] sm:$0xff]  ;;  %s1187_s19 = smov (!%p213_p8, %s965_s19), 3  ;;  %vm650_vm8 = vcmask 1047559  }
  0x33   : > { %756 = vmatpush3.msra.mxu0 %v227_v1  ;;  %774 = vmatprep.subr.mxu1 %v227_v1  ;;  %v224_v11 = vld [vmem:[%s1025_s9 + $0x38] sm:$0xff]  ;;  %v728_v12 = vld [vmem:[%s1174_s2] ss:$0 sm:$0xff]  ;;  %s727_s21 = sshll.u32 %s1187_s19, 3 }
  0x34   : > { %757 = vmatprep.subr.mxu0 %v226_v3  ;;  %778 = vmatpush3.msra.mxu1 %v227_v1  ;;  %v737_v14 = vld [vmem:[%s1175_s3] ss:$0 sm:$0xff]  ;;  %s216_s26 = scalar_lea.vmem %s1176_s4, %s727_s21 }
  0x35   : > { %758 = vmatpush3.msra.mxu0 %v226_v3  ;;  %775 = vmatprep.subr.mxu1 %v226_v3 }
  0x36   : > { %759 = vmatprep.subr.mxu0 %v225_v4  ;;  %779 = vmatpush3.msra.mxu1 %v226_v3 }
  0x37   : > { %760 = vmatpush3.msra.mxu0 %v225_v4  ;;  %776 = vmatprep.subr.mxu1 %v225_v4 }
  0x38   : > { %762 = vmatmul.mubr.msk.f32.vlgmr.msra.gmra.mxu0 %vm236_vm0, %v218_v5  ;;  %780 = vmatpush3.msra.mxu1 %v225_v4 }
  0x39   : > { %764 = vmatprep.mubr.msk.f32.mxu0 %vm236_vm0, %v219_v6  ;;  %767 = vmatprep.mubr.msk.f32.mxu1 %vm236_vm0, %v221_v7 }
  0x3a   : > { %768 = vmatmul.mubr.msk.f32.vlgmr.msra.gmra.mxu1 %vm236_vm0, %v222_v8 }
  0x3b   : > { %770 = vmatprep.mubr.msk.f32.mxu1 %vm236_vm0, %v223_v9 }
  0x3c   : > { %765 = vmatmul.mubr.msk.f32.gmra.mxu0 %vm236_vm0, %v220_v10 }
  0x3e   : > { %771 = vmatmul.mubr.msk.f32.gmra.mxu1 %vm236_vm0, %v224_v11 }
  0xf8   : > { %v763_v13 = vpop.f32.mrf.mxu0 }
  0xf9   : > { %v1065_v15 = vadd.f32 %v763_v13, %v728_v12 }
  0xfa   : > { %v327_v16 = vpop.f32.mrf.mxu0  ;;  %v769_v17 = vpop.f32.mrf.mxu1 }
  0xfb   : > { %v1067_v18 = vadd.f32 %v728_v12, %v327_v16  ;;  %v374_v19 = vmul.f32 %v737_v14, %v1065_v15  ;;  %v1079_v30 = vadd.f32 %v769_v17, %v728_v12 }
  0xfc   : > { %v766_v20 = vpop.f32.mrf.mxu0  ;;  %v347_v21 = vpop.f32.mrf.mxu1 }
  0xfd   : > { %v1070_v22 = vadd.f32 %v766_v20, %v728_v12  ;;  %v385_v23 = vsel %vm381_vm1, %v374_v19, 0.0  ;;  %v1073_v24 = vadd.f32 %v728_v12, %v347_v21  ;;  %v373_v25 = vmul.f32 %v737_v14, %v1067_v18 }
  0xfe   : > { %386 = vadd.xlane.f32.xlu0 %v385_v23  ;;  %v337_v26 = vpop.f32.mrf.mxu0  ;;  %v772_v27 = vpop.f32.mrf.mxu1  ;;  %v378_v41 = vmul.f32 %v737_v14, %v1079_v30 }
  0xff   : > { %v1076_v28 = vadd.f32 %v728_v12, %v337_v26  ;;  %v376_v29 = vmul.f32 %v737_v14, %v1070_v22  ;;  %v377_v32 = vmul.f32 %v737_v14, %v1073_v24  ;;  %v382_v34 = vsel %vm381_vm1, %v373_v25, 0.0 }
 0x100   : > { %v357_v31 = vpop.f32.mrf.mxu1  ;;  %v1089_v39 = vadd.f32 %v772_v27, %v728_v12  ;;  %v397_v43 = vsel %vm381_vm1, %v378_v41, 0.0 }
 0x101   : > { %v391_v33 = vsel %vm381_vm1, %v376_v29, 0.0  ;;  %v1084_v35 = vadd.f32 %v728_v12, %v357_v31  ;;  %v375_v36 = vmul.f32 %v737_v14, %v1076_v28  ;;  %v394_v37 = vsel %vm381_vm1, %v377_v32, 0.0 }
 0x102   : > { %392 = vadd.xlane.f32.xlu1 %v391_v33  ;;  %383 = vadd.xlane.f32.xlu0 %v382_v34  ;;  %v380_v44 = vmul.f32 %v737_v14, %v1089_v39 }
 0x103   : > { %v379_v38 = vmul.f32 %v737_v14, %v1084_v35  ;;  %v388_v40 = vsel %vm381_vm1, %v375_v36, 0.0 }
 0x104   : > { %v403_v45 = vsel %vm381_vm1, %v380_v44, 0.0 }
 0x105   : > { %v400_v42 = vsel %vm381_vm1, %v379_v38, 0.0 }
 0x106   : > { %389 = vadd.xlane.f32.xlu1 %v388_v40  ;;  %395 = vadd.xlane.f32.xlu0 %v394_v37 }
 0x10a   : > { %398 = vadd.xlane.f32.xlu1 %v397_v43  ;;  %401 = vadd.xlane.f32.xlu0 %v400_v42 }
 0x10e   : > { %404 = vadd.xlane.f32.xlu1 %v403_v45 }
 0x187   : > { %v387_v46 = vpop.xlane.xlu0 %386 }
 0x188   : > { %v412_v47 = vrot.slane %v387_v46, 4 }
 0x18a   : > { %v413_v48 = vmax.f32 %v387_v46, %v412_v47 }
 0x18b   : > { %v393_v49 = vpop.xlane.xlu1 %392  ;;  %v384_v50 = vpop.xlane.xlu0 %383 }
 0x18c   : > { %v414_v51 = vrot.slane %v413_v48, 2  ;;  %v424_v52 = vrot.slane %v393_v49, 4  ;;  %v406_v53 = vrot.slane %v384_v50, 4 }
 0x18e   : > { %v415_v54 = vmax.f32 %v413_v48, %v414_v51  ;;  %v425_v55 = vmax.f32 %v393_v49, %v424_v52  ;;  %v407_v56 = vmax.f32 %v384_v50, %v406_v53 }
 0x18f   : > { %v390_v57 = vpop.xlane.xlu1 %389  ;;  %v396_v58 = vpop.xlane.xlu0 %395 }
 0x190   : > { %v416_v59 = vrot.slane %v415_v54, 1  ;;  %v426_v60 = vrot.slane %v425_v55, 2  ;;  %v408_v61 = vrot.slane %v407_v56, 2  ;;  %v418_v62 = vrot.slane %v390_v57, 4 }
 0x191   : > { %v430_v63 = vrot.slane %v396_v58, 4 }
 0x192   : > { %v417_v0 = vmax.f32 %v415_v54, %v416_v59  ;;  %v427_v1 = vmax.f32 %v425_v55, %v426_v60  ;;  %v409_v2 = vmax.f32 %v407_v56, %v408_v61  ;;  %v419_v3 = vmax.f32 %v390_v57, %v418_v62 }
 0x193   : > { %v431_v4 = vmax.f32 %v396_v58, %v430_v63  ;;  %v399_v5 = vpop.xlane.xlu1 %398  ;;  %v402_v6 = vpop.xlane.xlu0 %401 }
 0x194   : > { %v455_v7 = vsub.f32 %v387_v46, %v417_v0  ;;  %v428_v8 = vrot.slane %v427_v1, 1  ;;  %v410_v9 = vrot.slane %v409_v2, 1  ;;  %v420_v10 = vrot.slane %v419_v3, 2 }
 0x195   : > { %v432_v11 = vrot.slane %v431_v4, 2  ;;  %v436_v12 = vrot.slane %v399_v5, 4  ;;  %v442_v13 = vrot.slane %v402_v6, 4 }
 0x196   : > { %v464_v14 = vmul.f32 1.442695, %v455_v7  ;;  %v429_v16 = vmax.f32 %v427_v1, %v428_v8  ;;  %v411_v17 = vmax.f32 %v409_v2, %v410_v9  ;;  %v421_v19 = vmax.f32 %v419_v3, %v420_v10 }
 0x197   : > { %v433_v20 = vmax.f32 %v431_v4, %v432_v11  ;;  %v437_v21 = vmax.f32 %v399_v5, %v436_v12  ;;  %v443_v23 = vmax.f32 %v402_v6, %v442_v13  ;;  %v405_v25 = vpop.xlane.xlu1 %404 }
 0x198   : > { %822 = vpow2.f32 %v464_v14  ;;  %v457_v26 = vsub.f32 %v393_v49, %v429_v16  ;;  %v454_v27 = vsub.f32 %v384_v50, %v411_v17  ;;  %v422_v29 = vrot.slane %v421_v19, 1 }
 0x199   : > { %v434_v31 = vrot.slane %v433_v20, 1  ;;  %v438_v32 = vrot.slane %v437_v21, 2  ;;  %v444_v33 = vrot.slane %v443_v23, 2  ;;  %v448_v34 = vrot.slane %v405_v25, 4 }
 0x19a   : > { %v468_v36 = vmul.f32 1.442695, %v457_v26  ;;  %v462_v37 = vmul.f32 1.442695, %v454_v27  ;;  %v423_v38 = vmax.f32 %v421_v19, %v422_v29 }
 0x19b   : > { %v435_v40 = vmax.f32 %v433_v20, %v434_v31  ;;  %v439_v41 = vmax.f32 %v437_v21, %v438_v32  ;;  %v445_v42 = vmax.f32 %v443_v23, %v444_v33  ;;  %v449_v43 = vmax.f32 %v405_v25, %v448_v34 }
 0x19c   : > { %824 = vpow2.f32 %v468_v36  ;;  %v456_v44 = vsub.f32 %v390_v57, %v423_v38 }
 0x19d   : > { %826 = vpow2.f32 %v462_v37  ;;  %v458_v45 = vsub.f32 %v396_v58, %v435_v40  ;;  %v440_v46 = vrot.slane %v439_v41, 1  ;;  %v446_v47 = vrot.slane %v445_v42, 1 }
 0x19e   : > { %v466_v48 = vmul.f32 1.442695, %v456_v44  ;;  %v450_v49 = vrot.slane %v449_v43, 2 }
 0x19f   : > { %v470_v50 = vmul.f32 1.442695, %v458_v45  ;;  %v441_v51 = vmax.f32 %v439_v41, %v440_v46  ;;  %v447_v52 = vmax.f32 %v445_v42, %v446_v47 }
 0x1a0   : > { %828 = vpow2.f32 %v466_v48  ;;  %v451_v53 = vmax.f32 %v449_v43, %v450_v49 }
 0x1a1   : > { %830 = vpow2.f32 %v470_v50  ;;  %v459_v54 = vsub.f32 %v399_v5, %v441_v51  ;;  %v460_v55 = vsub.f32 %v402_v6, %v447_v52 }
 0x1a2   : > { %v452_v56 = vrot.slane %v451_v53, 1 }
 0x1a3   : > { %v472_v59 = vmul.f32 1.442695, %v459_v54  ;;  %v474_v60 = vmul.f32 1.442695, %v460_v55 }
 0x1a4   : > { %v453_v61 = vmax.f32 %v451_v53, %v452_v56 }
 0x1a5   : > { %v1097_v62 = vpop.eup %822  ;;  %832 = vpow2.f32 %v472_v59 }
 0x1a6   : > { %v484_v57 = vrot.slane %v1097_v62, 4  ;;  %834 = vpow2.f32 %v474_v60  ;;  %v461_v58 = vsub.f32 %v405_v25, %v453_v61 }
 0x1a8   : > { %v485_v63 = vadd.f32 %v1097_v62, %v484_v57  ;;  %v476_v0 = vmul.f32 1.442695, %v461_v58 }
 0x1a9   : > { %v1101_v1 = vpop.eup %824 }
 0x1aa   : > { %v1103_v2 = vpop.eup %826  ;;  %v486_v3 = vrot.slane %v485_v63, 2  ;;  %v496_v4 = vrot.slane %v1101_v1, 4  ;;  %836 = vpow2.f32 %v476_v0 }
 0x1ab   : > { %v478_v5 = vrot.slane %v1103_v2, 4 }
 0x1ac   : > { %v487_v6 = vadd.f32 %v486_v3, %v485_v63  ;;  %v497_v7 = vadd.f32 %v1101_v1, %v496_v4 }
 0x1ad   : > { %v1108_v8 = vpop.eup %828  ;;  %v479_v9 = vadd.f32 %v1103_v2, %v478_v5 }
 0x1ae   : > { %v1111_v10 = vpop.eup %830  ;;  %v488_v11 = vrot.slane %v487_v6, 1  ;;  %v498_v12 = vrot.slane %v497_v7, 2  ;;  %v490_v13 = vrot.slane %v1108_v8, 4 }
 0x1af   : > { %v480_v14 = vrot.slane %v479_v9, 2  ;;  %v502_v16 = vrot.slane %v1111_v10, 4 }
 0x1b0   : > { %v489_v17 = vadd.f32 %v488_v11, %v487_v6  ;;  %v499_v19 = vadd.f32 %v498_v12, %v497_v7  ;;  %v491_v20 = vadd.f32 %v1108_v8, %v490_v13 }
 0x1b1   : > { %v481_v21 = vadd.f32 %v480_v14, %v479_v9  ;;  %v503_v23 = vadd.f32 %v1111_v10, %v502_v16 }
 0x1b2   : > { %v1117_v25 = vpop.eup %832  ;;  %838 = vrcp.f32 %v489_v17  ;;  %v500_v26 = vrot.slane %v499_v19, 1  ;;  %v492_v27 = vrot.slane %v491_v20, 2 }
 0x1b3   : > { %v1119_v29 = vpop.eup %834  ;;  %v482_v31 = vrot.slane %v481_v21, 1  ;;  %v504_v32 = vrot.slane %v503_v23, 2  ;;  %v508_v33 = vrot.slane %v1117_v25, 4 }
 0x1b4   : > { %v501_v34 = vadd.f32 %v500_v26, %v499_v19  ;;  %v493_v36 = vadd.f32 %v492_v27, %v491_v20  ;;  %v514_v37 = vrot.slane %v1119_v29, 4 }
 0x1b5   : > { %v483_v38 = vadd.f32 %v482_v31, %v481_v21  ;;  %v505_v40 = vadd.f32 %v504_v32, %v503_v23  ;;  %v509_v41 = vadd.f32 %v1117_v25, %v508_v33 }
 0x1b6   : > { %840 = vrcp.f32 %v501_v34  ;;  %v494_v42 = vrot.slane %v493_v36, 1  ;;  %v515_v43 = vadd.f32 %v1119_v29, %v514_v37 }
 0x1b7   : > { %v1125_v44 = vpop.eup %836  ;;  %842 = vrcp.f32 %v483_v38  ;;  %v506_v45 = vrot.slane %v505_v40, 1  ;;  %v510_v46 = vrot.slane %v509_v41, 2 }
 0x1b8   : > { %v495_v47 = vadd.f32 %v494_v42, %v493_v36  ;;  %v516_v48 = vrot.slane %v515_v43, 2  ;;  %v520_v49 = vrot.slane %v1125_v44, 4 }
 0x1b9   : > { %v507_v50 = vadd.f32 %v506_v45, %v505_v40  ;;  %v511_v51 = vadd.f32 %v510_v46, %v509_v41 }
 0x1ba   : > { %844 = vrcp.f32 %v495_v47  ;;  %v517_v52 = vadd.f32 %v516_v48, %v515_v43  ;;  %v521_v53 = vadd.f32 %v1125_v44, %v520_v49 }
 0x1bb   : > { %846 = vrcp.f32 %v507_v50  ;;  %v512_v54 = vrot.slane %v511_v51, 1 }
 0x1bc   : > { %v518_v55 = vrot.slane %v517_v52, 1  ;;  %v522_v56 = vrot.slane %v521_v53, 2 }
 0x1bd   : > { %v513_v59 = vadd.f32 %v512_v54, %v511_v51 }
 0x1be   : > { %v519_v60 = vadd.f32 %v518_v55, %v517_v52  ;;  %v523_v61 = vadd.f32 %v522_v56, %v521_v53 }
 0x1bf   : > { %v839_v57 = vpop.eup %838  ;;  %848 = vrcp.f32 %v513_v59 }
 0x1c0   : > { %v535_v58 = vmul.f32 %v839_v57, %v489_v17  ;;  %850 = vrcp.f32 %v519_v60  ;;  %v524_v63 = vrot.slane %v523_v61, 1 }
 0x1c2   : > { %v543_v0 = vsub.f32 2.0, %v535_v58  ;;  %v525_v3 = vadd.f32 %v524_v63, %v523_v61 }
 0x1c3   : > { %v841_v4 = vpop.eup %840 }
 0x1c4   : > { %v843_v5 = vpop.eup %842  ;;  %v551_v6 = vmul.f32 %v839_v57, %v543_v0  ;;  %v537_v7 = vmul.f32 %v841_v4, %v501_v34  ;;  %852 = vrcp.f32 %v525_v3 }
 0x1c5   : > { %v534_v9 = vmul.f32 %v843_v5, %v483_v38 }
 0x1c6   : > { %v559_v11 = vmul.f32 %v1097_v62, %v551_v6  ;;  %v545_v12 = vsub.f32 2.0, %v537_v7 }
 0x1c7   : > { %v845_v13 = vpop.eup %844  ;;  %v542_v14 = vsub.f32 2.0, %v534_v9 }
 0x1c8   : > { %v847_v16 = vpop.eup %846  ;;  %v567_v19 = vmul.f32 %v559_v11, %v1065_v15  ;;  %v553_v20 = vmul.f32 %v841_v4, %v545_v12  ;;  %v536_v17 = vmul.f32 %v845_v13, %v495_v47 }
 0x1c9   : > { %v550_v21 = vmul.f32 %v843_v5, %v542_v14  ;;  %v538_v23 = vmul.f32 %v847_v16, %v507_v50 }
 0x1ca   : > { %v581_v26 = vsel %vm381_vm1, %v567_v19, 0.0  ;;  %v561_v27 = vmul.f32 %v1101_v1, %v553_v20  ;;  %v544_v31 = vsub.f32 2.0, %v536_v17 }
 0x1cb   : > { %v582_v32 = vrot.slane %v581_v26, 4  ;;  %v558_v33 = vmul.f32 %v1103_v2, %v550_v21  ;;  %v546_v34 = vsub.f32 2.0, %v538_v23 }
 0x1cc   : > { %v849_v62 = vpop.eup %848  ;;  %v569_v36 = vmul.f32 %v561_v27, %v1070_v22  ;;  %v552_v37 = vmul.f32 %v845_v13, %v544_v31 }
 0x1cd   : > { %v851_v38 = vpop.eup %850  ;;  %v583_v40 = vadd.f32 %v582_v32, %v581_v26  ;;  %v566_v15 = vmul.f32 %v558_v33, %v1067_v18  ;;  %v554_v41 = vmul.f32 %v847_v16, %v546_v34  ;;  %v539_v42 = vmul.f32 %v849_v62, %v513_v59 }
 0x1ce   : > { %v595_v43 = vsel %vm381_vm1, %v569_v36, 0.0  ;;  %v560_v45 = vmul.f32 %v1108_v8, %v552_v37  ;;  %v540_v1 = vmul.f32 %v851_v38, %v519_v60 }
 0x1cf   : > { %v584_v46 = vrot.slane %v583_v40, 2  ;;  %v596_v47 = vrot.slane %v595_v43, 4  ;;  %v574_v2 = vsel %vm381_vm1, %v566_v15, 0.0  ;;  %v562_v48 = vmul.f32 %v1111_v10, %v554_v41 }
 0x1d0   : > { %v575_v49 = vrot.slane %v574_v2, 4  ;;  %v568_v22 = vmul.f32 %v560_v45, %v1076_v28  ;;  %v547_v50 = vsub.f32 2.0, %v539_v42  ;;  %v548_v51 = vsub.f32 2.0, %v540_v1 }
 0x1d1   : > { %v597_v52 = vadd.f32 %v596_v47, %v595_v43  ;;  %v570_v18 = vmul.f32 %v562_v48, %v1073_v24  ;;  %v853_v53 = vpop.eup %852  ;;  %v585_v59 = vadd.f32 %v584_v46, %v583_v40 }
 0x1d2   : > { %v576_v54 = vadd.f32 %v575_v49, %v574_v2  ;;  %v588_v55 = vsel %vm381_vm1, %v568_v22, 0.0  ;;  %v555_v8 = vmul.f32 %v849_v62, %v547_v50  ;;  %v556_v56 = vmul.f32 %v851_v38, %v548_v51 }
 0x1d3   : > { %v589_v60 = vrot.slane %v588_v55, 4  ;;  %v602_v61 = vsel %vm381_vm1, %v570_v18, 0.0  ;;  %v598_v63 = vrot.slane %v597_v52, 2  ;;  %v541_v4 = vmul.f32 %v853_v53, %v525_v3 }
 0x1d4   : > { %v577_v57 = vrot.slane %v576_v54, 2  ;;  %v603_v10 = vrot.slane %v602_v61, 4  ;;  %v563_v58 = vmul.f32 %v1117_v25, %v555_v8  ;;  %v564_v28 = vmul.f32 %v1119_v29, %v556_v56 }
 0x1d5   : > { %v590_v0 = vadd.f32 %v589_v60, %v588_v55  ;;  %v586_v9 = vrot.slane %v585_v59, 1  ;;  %v549_v12 = vsub.f32 2.0, %v541_v4  ;;  %v599_v19 = vadd.f32 %v598_v63, %v597_v52 }
 0x1d6   : > { %v578_v24 = vadd.f32 %v577_v57, %v576_v54  ;;  %v604_v5 = vadd.f32 %v603_v10, %v602_v61  ;;  %v571_v6 = vmul.f32 %v563_v58, %v1079_v30  ;;  %v572_v7 = vmul.f32 %v564_v28, %v1084_v35 }
 0x1d7   : > { %v591_v11 = vrot.slane %v590_v0, 2  ;;  %v557_v3 = vmul.f32 %v853_v53, %v549_v12  ;;  %v587_v35 = vadd.f32 %v586_v9, %v585_v59  ;;  %v600_v32 = vrot.slane %v599_v19, 1 }
 0x1d8   : > { %v579_v13 = vrot.slane %v578_v24, 1  ;;  %v605_v14 = vrot.slane %v604_v5, 2  ;;  %v609_v16 = vsel %vm381_vm1, %v571_v6, 0.0  ;;  %v616_v25 = vsel %vm381_vm1, %v572_v7, 0.0 }
 0x1d9   : > { %v592_v29 = vadd.f32 %v591_v11, %v590_v0  ;;  %v610_v20 = vrot.slane %v609_v16, 4  ;;  %v617_v17 = vrot.slane %v616_v25, 4  ;;  %v565_v31 = vmul.f32 %v1125_v44, %v557_v3 }
 0x1da   : > { %v580_v21 = vadd.f32 %v579_v13, %v578_v24  ;;  %v606_v27 = vadd.f32 %v605_v14, %v604_v5  ;;  %v601_v43 = vadd.f32 %v600_v32, %v599_v19 }
 0x1db   : > { %v593_v23 = vrot.slane %v592_v29, 1  ;;  %v611_v30 = vadd.f32 %v610_v20, %v609_v16  ;;  %v618_v26 = vadd.f32 %v617_v17, %v616_v25  ;;  %v573_v36 = vmul.f32 %v565_v31, %v1089_v39 }
 0x1dc   : > { %v639_v37 = vsel %vm638_vm2, %v587_v35, %v580_v21  ;;  %v607_v15 = vrot.slane %v606_v27, 1 }
 0x1dd   : > { %v594_v33 = vadd.f32 %v593_v23, %v592_v29  ;;  %v612_v34 = vrot.slane %v611_v30, 2  ;;  %v619_v62 = vrot.slane %v618_v26, 2  ;;  %v623_v42 = vsel %vm381_vm1, %v573_v36, 0.0 }
 0x1de   : > { %v624_v1 = vrot.slane %v623_v42, 4  ;;  %v608_v47 = vadd.f32 %v607_v15, %v606_v27 }
 0x1df   : > { %v613_v38 = vadd.f32 %v612_v34, %v611_v30  ;;  %v641_v40 = vsel %vm640_vm3, %v594_v33, %v639_v37  ;;  %v620_v41 = vadd.f32 %v619_v62, %v618_v26 }
 0x1e0   : > { %v643_v44 = vsel %vm642_vm4, %v601_v43, %v641_v40  ;;  %v625_v46 = vadd.f32 %v624_v1, %v623_v42 }
 0x1e1   : > { %v614_v45 = vrot.slane %v613_v38, 1  ;;  %v621_v2 = vrot.slane %v620_v41, 1  ;;  %v645_v49 = vsel %vm644_vm5, %v608_v47, %v643_v44 }
 0x1e2   : > { %v626_v48 = vrot.slane %v625_v46, 2 }
 0x1e3   : > { %v615_v39 = vadd.f32 %v614_v45, %v613_v38  ;;  %v622_v50 = vadd.f32 %v621_v2, %v620_v41 }
 0x1e4   : > { %v627_v22 = vadd.f32 %v626_v48, %v625_v46 }
 0x1e5   : > { %v647_v51 = vsel %vm646_vm6, %v615_v39, %v645_v49 }
 0x1e6   : > { %v628_v52 = vrot.slane %v627_v22, 1  ;;  %v649_v53 = vsel %vm648_vm7, %v622_v50, %v647_v51 }
 0x1e8   : > { %v629_v18 = vadd.f32 %v628_v52, %v627_v22 }
 0x1ea   : > { %v651_v54 = vsel %vm650_vm8, %v629_v18, %v649_v53 }
 0x1eb   : > { %653 = vst.msk [vmem:[%s216_s26] sm:$0xff] %vm381_vm1, %v651_v54 }
 0x1ec PF: > { %p14_p9 = scmp.ge.s32.totalorder %s968_s20, 6   ;;  %s1182_s15 = smov %s908_s16 }
 0x1ed   : > { %s1183_s16 = smov %s912_s17  ;;  %s1184_s17 = smov %s978_s23 }
 0x1ee   : > { %s1185_s18 = smov %s968_s20  ;;  %16 = sbr.rel (!%p14_p9) target bundleno = 3 (0x3), region = 76 }
 0x1f3   :  { %673 = vsyncpa [#allocation3], 1 }
 0x1f4   :  { %675 = vsyncpa [#allocation3 + $0x1], 1 }

</bundles_post_ra>
